<compile_context>
chip_gen: v7x
topology: tpu7x:2x2x1
jax: 0.10.0
libtpu: 0.0.40
codegen_flags: <defaults>
</compile_context>

<pallas_src>
import math
import functools

import jax
import jax.numpy as jnp
from jax import lax
from jax.experimental import pallas as pl
from jax.experimental.pallas import tpu as pltpu


def _mha_kernel(q_ref, k_ref, v_ref,
                wq_ref, bq_ref, wk_ref, bk_ref, wv_ref, bv_ref,
                wo_ref, bo_ref,
                o_ref,
                ctx_ref,
                *, h, d_k):
    """One grid step = one (batch, query-tile): QKV projections, per-head
    scaled-dot-product attention with softmax, head write-out, output proj."""
    # bf16 activation tiles for this grid step
    xq = q_ref[...]          # (TQ, D)
    xk = k_ref[...]          # (S,  D)
    xv = v_ref[...]          # (S,  D)

    # Projections: bf16 MXU matmuls, f32 accumulation, f32 bias add.
    qp = jnp.dot(xq, wq_ref[...], preferred_element_type=jnp.float32) + bq_ref[...]
    kp = jnp.dot(xk, wk_ref[...], preferred_element_type=jnp.float32) + bk_ref[...]
    vp = jnp.dot(xv, wv_ref[...], preferred_element_type=jnp.float32) + bv_ref[...]

    # Pre-scale Q once (moves h*TQ*S multiplies down to TQ*D).
    qp = qp * (1.0 / math.sqrt(d_k))

    # Cast MXU operands to bf16 once, whole-tile (softmax math stays f32).
    qp_b = qp.astype(jnp.bfloat16)
    kp_b = kp.astype(jnp.bfloat16)
    vp_b = vp.astype(jnp.bfloat16)

    # Contract on the last dim of both operands -> no kh.T / XLU transpose.
    dn_nt = (((1,), (1,)), ((), ()))

    # h is small & static -> unrolled loop; per-head matmuls are independent
    # so the scheduler can pipeline them on the MXU.
    for hi in range(h):
        lo = hi * d_k
        qh = qp_b[:, lo:lo + d_k]        # (TQ, d_k)
        kh = kp_b[:, lo:lo + d_k]        # (S,  d_k)
        vh = vp_b[:, lo:lo + d_k]        # (S,  d_k)

        scores = lax.dot_general(qh, kh, dn_nt,
                                 preferred_element_type=jnp.float32)  # (TQ, S)
        # numerically-stable softmax over keys (matches F.softmax(dim=-1))
        scores = scores - jnp.max(scores, axis=-1, keepdims=True)
        p = jnp.exp(scores)
        p = p * pl.reciprocal(jnp.sum(p, axis=-1, keepdims=True), approx=True)

        ctx_h = jnp.dot(p.astype(jnp.bfloat16), vh,
                        preferred_element_type=jnp.float32)           # (TQ, d_k)
        # Write this head's context straight into its (TQ, D) scratch slice
        # (== transpose(1,2).view(B,-1,h*d_k)); no concatenate copies.
        ctx_ref[:, lo:lo + d_k] = ctx_h

    # Output linear: one K=D matmul from the assembled context.
    out = jnp.dot(ctx_ref[...].astype(jnp.bfloat16), wo_ref[...],
                  preferred_element_type=jnp.float32) + bo_ref[...]
    o_ref[...] = out.astype(o_ref.dtype)


def _pick_q_tile(s):
    """Query-sequence tile: whole sequence when small, else a divisor that is a
    multiple of 8 (keeps the (8,128) BlockSpec constraint satisfied)."""
    if s <= 256:
        return s
    for cand in (256, 128, 64, 32, 16, 8):
        if s % cand == 0:
            return cand
    return s


def multi_headed_attention(query, key, value, params, *, h):
    """query/key/value: [B, S, D] float32. params: dict of torch-layout weights."""
    B, S, D = query.shape
    assert D % h == 0
    d_k = D // h

    TQ = _pick_q_tile(S)
    n_qt = S // TQ
    out_dtype = query.dtype
    mxu_dtype = jnp.bfloat16

    # Glue: bf16 activations/weights for the MXU; biases stay f32 (added
    # post-accumulation). Torch Linear weights [out, in] -> [in, out].
    q_in = query.astype(mxu_dtype)
    k_in = key.astype(mxu_dtype)
    v_in = value.astype(mxu_dtype)

    wq_t = params["wq"].T.astype(mxu_dtype)
    wk_t = params["wk"].T.astype(mxu_dtype)
    wv_t = params["wv"].T.astype(mxu_dtype)
    wo_t = params["wo"].T.astype(mxu_dtype)
    bq = params["bq"].reshape(1, D).astype(jnp.float32)
    bk = params["bk"].reshape(1, D).astype(jnp.float32)
    bv = params["bv"].reshape(1, D).astype(jnp.float32)
    bo = params["bo"].reshape(1, D).astype(jnp.float32)

    q_spec = pl.BlockSpec((None, TQ, D), lambda b, t: (b, t, 0))   # tiled over S
    kv_spec = pl.BlockSpec((None, S, D), lambda b, t: (b, 0, 0))   # full K/V per batch
    w_spec = pl.BlockSpec((D, D), lambda b, t: (0, 0))
    b_spec = pl.BlockSpec((1, D), lambda b, t: (0, 0))
    out_spec = pl.BlockSpec((None, TQ, D), lambda b, t: (b, t, 0))

    kernel = functools.partial(_mha_kernel, h=h, d_k=d_k)

    return pl.pallas_call(
        kernel,
        out_shape=jax.ShapeDtypeStruct((B, S, D), out_dtype),
        grid_spec=pltpu.PrefetchScalarGridSpec(
            num_scalar_prefetch=0,
            grid=(B, n_qt),
            in_specs=[q_spec, kv_spec, kv_spec,
                      w_spec, b_spec, w_spec, b_spec, w_spec, b_spec,
                      w_spec, b_spec],
            out_specs=out_spec,
            scratch_shapes=[pltpu.VMEM((TQ, D), jnp.float32)],  # assembled context
        ),
        compiler_params=pltpu.CompilerParams(
            dimension_semantics=("parallel", "parallel"),
            vmem_limit_bytes=64 * 1024 * 1024,
        ),
    )(q_in, k_in, v_in,
      wq_t, bq, wk_t, bk, wv_t, bv, wo_t, bo)


def _reference(query, key, value, params, *, h):
    """Pure-JAX f32 reference mirroring the PyTorch forward (eval mode)."""
    B, S, D = query.shape
    d_k = D // h

    def lin(x, w, b):
        return x @ w.T + b

    def split_heads(x):
        return x.reshape(B, S, h, d_k).transpose(0, 2, 1, 3)  # (B, h, S, d_k)

    q = split_heads(lin(query, params["wq"], params["bq"]))
    k = split_heads(lin(key, params["wk"], params["bk"]))
    v = split_heads(lin(value, params["wv"], params["bv"]))

    scores = jnp.einsum("bhqd,bhkd->bhqk", q, k) / math.sqrt(d_k)
    p = jax.nn.softmax(scores, axis=-1)
    ctx = jnp.einsum("bhqk,bhkd->bhqd", p, v)
    ctx = ctx.transpose(0, 2, 1, 3).reshape(B, S, D)
    return lin(ctx, params["wo"], params["bo"])


if __name__ == "__main__":
    B, S, D, H = 2, 8, 32, 4  # batch, seq, d_model, heads

    key0 = jax.random.PRNGKey(0)
    keys = jax.random.split(key0, 11)

    bound = 1.0 / math.sqrt(D)  # nn.Linear default init range

    def init_w(k):
        return jax.random.uniform(k, (D, D), jnp.float32, -bound, bound)

    def init_b(k):
        return jax.random.uniform(k, (D,), jnp.float32, -bound, bound)

    params = {
        "wq": init_w(keys[0]), "bq": init_b(keys[1]),
        "wk": init_w(keys[2]), "bk": init_b(keys[3]),
        "wv": init_w(keys[4]), "bv": init_b(keys[5]),
        "wo": init_w(keys[6]), "bo": init_b(keys[7]),
    }

    query = jax.random.normal(keys[8], (B, S, D), jnp.float32)
    key_in = jax.random.normal(keys[9], (B, S, D), jnp.float32)
    value = jax.random.normal(keys[10], (B, S, D), jnp.float32)

    out = multi_headed_attention(query, key_in, value, params, h=H)
    out = jax.block_until_ready(out)

    ref = _reference(query, key_in, value, params, h=H)
    assert out.shape == (B, S, D)
    # bf16 MXU operands + approx reciprocal -> looser tolerance than pure-f32.
    assert jnp.allclose(out, ref, atol=5e-2, rtol=5e-2), "mismatch vs reference"

    print("KERNEL_OK")
</pallas_src>

<mosaic_0001>
module attributes {stable_mosaic.version = 11 : i64} {
  func.func @_mha_kernel(%arg0: i32, %arg1: i32, %arg2: memref<1x8x32xbf16, #tpu.memory_space<vmem>>, %arg3: memref<1x8x32xbf16, #tpu.memory_space<vmem>>, %arg4: memref<1x8x32xbf16, #tpu.memory_space<vmem>>, %arg5: memref<32x32xbf16, #tpu.memory_space<vmem>>, %arg6: memref<1x32xf32, #tpu.memory_space<vmem>>, %arg7: memref<32x32xbf16, #tpu.memory_space<vmem>>, %arg8: memref<1x32xf32, #tpu.memory_space<vmem>>, %arg9: memref<32x32xbf16, #tpu.memory_space<vmem>>, %arg10: memref<1x32xf32, #tpu.memory_space<vmem>>, %arg11: memref<32x32xbf16, #tpu.memory_space<vmem>>, %arg12: memref<1x32xf32, #tpu.memory_space<vmem>>, %arg13: memref<1x8x32xf32, #tpu.memory_space<vmem>>, %arg14: memref<8x32xf32, #tpu.memory_space<vmem>>) attributes {dimension_semantics = [#tpu.dimension_semantics<parallel>, #tpu.dimension_semantics<parallel>], iteration_bounds = array<i64: 2, 1>, scalar_prefetch = 0 : i64, scratch_operands = 1 : i64, tpu.core_type = #tpu.core_type<tc>, window_params = [{transform_indices = @transform_0, window_bounds = array<i64: 1, 8, 32>}, {transform_indices = @transform_1, window_bounds = array<i64: 1, 8, 32>}, {transform_indices = @transform_2, window_bounds = array<i64: 1, 8, 32>}, {pipeline_mode = #tpu.pipeline_mode<synchronous>, transform_indices = @transform_3, window_bounds = array<i64: 32, 32>}, {pipeline_mode = #tpu.pipeline_mode<synchronous>, transform_indices = @transform_4, window_bounds = array<i64: 1, 32>}, {pipeline_mode = #tpu.pipeline_mode<synchronous>, transform_indices = @transform_5, window_bounds = array<i64: 32, 32>}, {pipeline_mode = #tpu.pipeline_mode<synchronous>, transform_indices = @transform_6, window_bounds = array<i64: 1, 32>}, {pipeline_mode = #tpu.pipeline_mode<synchronous>, transform_indices = @transform_7, window_bounds = array<i64: 32, 32>}, {pipeline_mode = #tpu.pipeline_mode<synchronous>, transform_indices = @transform_8, window_bounds = array<i64: 1, 32>}, {pipeline_mode = #tpu.pipeline_mode<synchronous>, transform_indices = @transform_9, window_bounds = array<i64: 32, 32>}, {pipeline_mode = #tpu.pipeline_mode<synchronous>, transform_indices = @transform_10, window_bounds = array<i64: 1, 32>}, {transform_indices = @transform_11, window_bounds = array<i64: 1, 8, 32>}]} {
    %c0 = arith.constant 0 : index
    %c0_0 = arith.constant 0 : index
    %c0_1 = arith.constant 0 : index
    %0 = vector.load %arg2[%c0, %c0_0, %c0_1] : memref<1x8x32xbf16, #tpu.memory_space<vmem>>, vector<1x8x32xbf16>
    %1 = vector.shape_cast %0 : vector<1x8x32xbf16> to vector<8x32xbf16>
    %c0_2 = arith.constant 0 : index
    %c0_3 = arith.constant 0 : index
    %c0_4 = arith.constant 0 : index
    %2 = vector.load %arg3[%c0_2, %c0_3, %c0_4] : memref<1x8x32xbf16, #tpu.memory_space<vmem>>, vector<1x8x32xbf16>
    %3 = vector.shape_cast %2 : vector<1x8x32xbf16> to vector<8x32xbf16>
    %c0_5 = arith.constant 0 : index
    %c0_6 = arith.constant 0 : index
    %c0_7 = arith.constant 0 : index
    %4 = vector.load %arg4[%c0_5, %c0_6, %c0_7] : memref<1x8x32xbf16, #tpu.memory_space<vmem>>, vector<1x8x32xbf16>
    %5 = vector.shape_cast %4 : vector<1x8x32xbf16> to vector<8x32xbf16>
    %c0_8 = arith.constant 0 : index
    %c0_9 = arith.constant 0 : index
    %6 = vector.load %arg5[%c0_8, %c0_9] : memref<32x32xbf16, #tpu.memory_space<vmem>>, vector<32x32xbf16>
    %cst = arith.constant dense<0.000000e+00> : vector<8x32xf32>
    %7 = tpu.matmul %1, %6, %cst {dimension_numbers = #tpu.dot_dimension_numbers<[1], [0], [0], [1], [0, 0, 1, 1], [], []>} : vector<8x32xbf16>, vector<32x32xbf16>, vector<8x32xf32> -> vector<8x32xf32>
    %c0_10 = arith.constant 0 : index
    %c0_11 = arith.constant 0 : index
    %8 = vector.load %arg6[%c0_10, %c0_11] : memref<1x32xf32, #tpu.memory_space<vmem>>, vector<1x32xf32>
    %9 = vector.broadcast %8 : vector<1x32xf32> to vector<8x32xf32>
    %10 = arith.addf %7, %9 : vector<8x32xf32>
    %c0_12 = arith.constant 0 : index
    %c0_13 = arith.constant 0 : index
    %11 = vector.load %arg7[%c0_12, %c0_13] : memref<32x32xbf16, #tpu.memory_space<vmem>>, vector<32x32xbf16>
    %cst_14 = arith.constant dense<0.000000e+00> : vector<8x32xf32>
    %12 = tpu.matmul %3, %11, %cst_14 {dimension_numbers = #tpu.dot_dimension_numbers<[1], [0], [0], [1], [0, 0, 1, 1], [], []>} : vector<8x32xbf16>, vector<32x32xbf16>, vector<8x32xf32> -> vector<8x32xf32>
    %c0_15 = arith.constant 0 : index
    %c0_16 = arith.constant 0 : index
    %13 = vector.load %arg8[%c0_15, %c0_16] : memref<1x32xf32, #tpu.memory_space<vmem>>, vector<1x32xf32>
    %14 = vector.broadcast %13 : vector<1x32xf32> to vector<8x32xf32>
    %15 = arith.addf %12, %14 : vector<8x32xf32>
    %c0_17 = arith.constant 0 : index
    %c0_18 = arith.constant 0 : index
    %16 = vector.load %arg9[%c0_17, %c0_18] : memref<32x32xbf16, #tpu.memory_space<vmem>>, vector<32x32xbf16>
    %cst_19 = arith.constant dense<0.000000e+00> : vector<8x32xf32>
    %17 = tpu.matmul %5, %16, %cst_19 {dimension_numbers = #tpu.dot_dimension_numbers<[1], [0], [0], [1], [0, 0, 1, 1], [], []>} : vector<8x32xbf16>, vector<32x32xbf16>, vector<8x32xf32> -> vector<8x32xf32>
    %c0_20 = arith.constant 0 : index
    %c0_21 = arith.constant 0 : index
    %18 = vector.load %arg10[%c0_20, %c0_21] : memref<1x32xf32, #tpu.memory_space<vmem>>, vector<1x32xf32>
    %19 = vector.broadcast %18 : vector<1x32xf32> to vector<8x32xf32>
    %20 = arith.addf %17, %19 : vector<8x32xf32>
    %cst_22 = arith.constant 0.353553385 : f32
    %21 = vector.broadcast %cst_22 : f32 to vector<8x32xf32>
    %22 = arith.mulf %10, %21 : vector<8x32xf32>
    %23 = arith.truncf %22 : vector<8x32xf32> to vector<8x32xbf16>
    %24 = arith.truncf %15 : vector<8x32xf32> to vector<8x32xbf16>
    %25 = arith.truncf %20 : vector<8x32xf32> to vector<8x32xbf16>
    %26 = vector.extract_strided_slice %23 {offsets = [0, 0], sizes = [8, 8], strides = [1, 1]} : vector<8x32xbf16> to vector<8x8xbf16>
    %27 = vector.extract_strided_slice %24 {offsets = [0, 0], sizes = [8, 8], strides = [1, 1]} : vector<8x32xbf16> to vector<8x8xbf16>
    %28 = vector.extract_strided_slice %25 {offsets = [0, 0], sizes = [8, 8], strides = [1, 1]} : vector<8x32xbf16> to vector<8x8xbf16>
    %cst_23 = arith.constant dense<0.000000e+00> : vector<8x8xf32>
    %29 = tpu.matmul %26, %27, %cst_23 {dimension_numbers = #tpu.dot_dimension_numbers<[1], [1], [0], [0], [0, 0, 1, 0], [], []>} : vector<8x8xbf16>, vector<8x8xbf16>, vector<8x8xf32> -> vector<8x8xf32>
    %cst_24 = arith.constant dense<0xFF800000> : vector<8xf32>
    %30 = vector.multi_reduction <maximumf>, %29, %cst_24 [1] : vector<8x8xf32> to vector<8xf32>
    %31 = vector.shape_cast %30 : vector<8xf32> to vector<8x1xf32>
    %32 = vector.broadcast %31 : vector<8x1xf32> to vector<8x8xf32>
    %33 = arith.subf %29, %32 : vector<8x8xf32>
    %34 = math.exp %33 : vector<8x8xf32>
    %cst_25 = arith.constant dense<0.000000e+00> : vector<8xf32>
    %35 = vector.multi_reduction <add>, %34, %cst_25 [1] : vector<8x8xf32> to vector<8xf32>
    %36 = vector.shape_cast %35 : vector<8xf32> to vector<8x1xf32>
    %37 = tpu.reciprocal %36 {approx = true} : vector<8x1xf32> -> vector<8x1xf32>
    %38 = vector.broadcast %37 : vector<8x1xf32> to vector<8x8xf32>
    %39 = arith.mulf %34, %38 : vector<8x8xf32>
    %40 = arith.truncf %39 : vector<8x8xf32> to vector<8x8xbf16>
    %cst_26 = arith.constant dense<0.000000e+00> : vector<8x8xf32>
    %41 = tpu.matmul %40, %28, %cst_26 {dimension_numbers = #tpu.dot_dimension_numbers<[1], [0], [0], [1], [0, 0, 1, 1], [], []>} : vector<8x8xbf16>, vector<8x8xbf16>, vector<8x8xf32> -> vector<8x8xf32>
    %c0_27 = arith.constant 0 : index
    %c0_28 = arith.constant 0 : index
    %42 = vector.load %arg14[%c0_27, %c0_28] : memref<8x32xf32, #tpu.memory_space<vmem>>, vector<8x8xf32>
    tpu.vector_store %arg14[%c0_27, %c0_28], %41 {strides = array<i32>} : memref<8x32xf32, #tpu.memory_space<vmem>>, vector<8x8xf32>,
    %43 = vector.extract_strided_slice %23 {offsets = [0, 8], sizes = [8, 8], strides = [1, 1]} : vector<8x32xbf16> to vector<8x8xbf16>
    %44 = vector.extract_strided_slice %24 {offsets = [0, 8], sizes = [8, 8], strides = [1, 1]} : vector<8x32xbf16> to vector<8x8xbf16>
    %45 = vector.extract_strided_slice %25 {offsets = [0, 8], sizes = [8, 8], strides = [1, 1]} : vector<8x32xbf16> to vector<8x8xbf16>
    %cst_29 = arith.constant dense<0.000000e+00> : vector<8x8xf32>
    %46 = tpu.matmul %43, %44, %cst_29 {dimension_numbers = #tpu.dot_dimension_numbers<[1], [1], [0], [0], [0, 0, 1, 0], [], []>} : vector<8x8xbf16>, vector<8x8xbf16>, vector<8x8xf32> -> vector<8x8xf32>
    %cst_30 = arith.constant dense<0xFF800000> : vector<8xf32>
    %47 = vector.multi_reduction <maximumf>, %46, %cst_30 [1] : vector<8x8xf32> to vector<8xf32>
    %48 = vector.shape_cast %47 : vector<8xf32> to vector<8x1xf32>
    %49 = vector.broadcast %48 : vector<8x1xf32> to vector<8x8xf32>
    %50 = arith.subf %46, %49 : vector<8x8xf32>
    %51 = math.exp %50 : vector<8x8xf32>
    %cst_31 = arith.constant dense<0.000000e+00> : vector<8xf32>
    %52 = vector.multi_reduction <add>, %51, %cst_31 [1] : vector<8x8xf32> to vector<8xf32>
    %53 = vector.shape_cast %52 : vector<8xf32> to vector<8x1xf32>
    %54 = tpu.reciprocal %53 {approx = true} : vector<8x1xf32> -> vector<8x1xf32>
    %55 = vector.broadcast %54 : vector<8x1xf32> to vector<8x8xf32>
    %56 = arith.mulf %51, %55 : vector<8x8xf32>
    %57 = arith.truncf %56 : vector<8x8xf32> to vector<8x8xbf16>
    %cst_32 = arith.constant dense<0.000000e+00> : vector<8x8xf32>
    %58 = tpu.matmul %57, %45, %cst_32 {dimension_numbers = #tpu.dot_dimension_numbers<[1], [0], [0], [1], [0, 0, 1, 1], [], []>} : vector<8x8xbf16>, vector<8x8xbf16>, vector<8x8xf32> -> vector<8x8xf32>
    %c0_33 = arith.constant 0 : index
    %c8 = arith.constant 8 : index
    %59 = vector.load %arg14[%c0_33, %c8] : memref<8x32xf32, #tpu.memory_space<vmem>>, vector<8x8xf32>
    tpu.vector_store %arg14[%c0_33, %c8], %58 {strides = array<i32>} : memref<8x32xf32, #tpu.memory_space<vmem>>, vector<8x8xf32>,
    %60 = vector.extract_strided_slice %23 {offsets = [0, 16], sizes = [8, 8], strides = [1, 1]} : vector<8x32xbf16> to vector<8x8xbf16>
    %61 = vector.extract_strided_slice %24 {offsets = [0, 16], sizes = [8, 8], strides = [1, 1]} : vector<8x32xbf16> to vector<8x8xbf16>
    %62 = vector.extract_strided_slice %25 {offsets = [0, 16], sizes = [8, 8], strides = [1, 1]} : vector<8x32xbf16> to vector<8x8xbf16>
    %cst_34 = arith.constant dense<0.000000e+00> : vector<8x8xf32>
    %63 = tpu.matmul %60, %61, %cst_34 {dimension_numbers = #tpu.dot_dimension_numbers<[1], [1], [0], [0], [0, 0, 1, 0], [], []>} : vector<8x8xbf16>, vector<8x8xbf16>, vector<8x8xf32> -> vector<8x8xf32>
    %cst_35 = arith.constant dense<0xFF800000> : vector<8xf32>
    %64 = vector.multi_reduction <maximumf>, %63, %cst_35 [1] : vector<8x8xf32> to vector<8xf32>
    %65 = vector.shape_cast %64 : vector<8xf32> to vector<8x1xf32>
    %66 = vector.broadcast %65 : vector<8x1xf32> to vector<8x8xf32>
    %67 = arith.subf %63, %66 : vector<8x8xf32>
    %68 = math.exp %67 : vector<8x8xf32>
    %cst_36 = arith.constant dense<0.000000e+00> : vector<8xf32>
    %69 = vector.multi_reduction <add>, %68, %cst_36 [1] : vector<8x8xf32> to vector<8xf32>
    %70 = vector.shape_cast %69 : vector<8xf32> to vector<8x1xf32>
    %71 = tpu.reciprocal %70 {approx = true} : vector<8x1xf32> -> vector<8x1xf32>
    %72 = vector.broadcast %71 : vector<8x1xf32> to vector<8x8xf32>
    %73 = arith.mulf %68, %72 : vector<8x8xf32>
    %74 = arith.truncf %73 : vector<8x8xf32> to vector<8x8xbf16>
    %cst_37 = arith.constant dense<0.000000e+00> : vector<8x8xf32>
    %75 = tpu.matmul %74, %62, %cst_37 {dimension_numbers = #tpu.dot_dimension_numbers<[1], [0], [0], [1], [0, 0, 1, 1], [], []>} : vector<8x8xbf16>, vector<8x8xbf16>, vector<8x8xf32> -> vector<8x8xf32>
    %c0_38 = arith.constant 0 : index
    %c16 = arith.constant 16 : index
    %76 = vector.load %arg14[%c0_38, %c16] : memref<8x32xf32, #tpu.memory_space<vmem>>, vector<8x8xf32>
    tpu.vector_store %arg14[%c0_38, %c16], %75 {strides = array<i32>} : memref<8x32xf32, #tpu.memory_space<vmem>>, vector<8x8xf32>,
    %77 = vector.extract_strided_slice %23 {offsets = [0, 24], sizes = [8, 8], strides = [1, 1]} : vector<8x32xbf16> to vector<8x8xbf16>
    %78 = vector.extract_strided_slice %24 {offsets = [0, 24], sizes = [8, 8], strides = [1, 1]} : vector<8x32xbf16> to vector<8x8xbf16>
    %79 = vector.extract_strided_slice %25 {offsets = [0, 24], sizes = [8, 8], strides = [1, 1]} : vector<8x32xbf16> to vector<8x8xbf16>
    %cst_39 = arith.constant dense<0.000000e+00> : vector<8x8xf32>
    %80 = tpu.matmul %77, %78, %cst_39 {dimension_numbers = #tpu.dot_dimension_numbers<[1], [1], [0], [0], [0, 0, 1, 0], [], []>} : vector<8x8xbf16>, vector<8x8xbf16>, vector<8x8xf32> -> vector<8x8xf32>
    %cst_40 = arith.constant dense<0xFF800000> : vector<8xf32>
    %81 = vector.multi_reduction <maximumf>, %80, %cst_40 [1] : vector<8x8xf32> to vector<8xf32>
    %82 = vector.shape_cast %81 : vector<8xf32> to vector<8x1xf32>
    %83 = vector.broadcast %82 : vector<8x1xf32> to vector<8x8xf32>
    %84 = arith.subf %80, %83 : vector<8x8xf32>
    %85 = math.exp %84 : vector<8x8xf32>
    %cst_41 = arith.constant dense<0.000000e+00> : vector<8xf32>
    %86 = vector.multi_reduction <add>, %85, %cst_41 [1] : vector<8x8xf32> to vector<8xf32>
    %87 = vector.shape_cast %86 : vector<8xf32> to vector<8x1xf32>
    %88 = tpu.reciprocal %87 {approx = true} : vector<8x1xf32> -> vector<8x1xf32>
    %89 = vector.broadcast %88 : vector<8x1xf32> to vector<8x8xf32>
    %90 = arith.mulf %85, %89 : vector<8x8xf32>
    %91 = arith.truncf %90 : vector<8x8xf32> to vector<8x8xbf16>
    %cst_42 = arith.constant dense<0.000000e+00> : vector<8x8xf32>
    %92 = tpu.matmul %91, %79, %cst_42 {dimension_numbers = #tpu.dot_dimension_numbers<[1], [0], [0], [1], [0, 0, 1, 1], [], []>} : vector<8x8xbf16>, vector<8x8xbf16>, vector<8x8xf32> -> vector<8x8xf32>
    %c0_43 = arith.constant 0 : index
    %c24 = arith.constant 24 : index
    %93 = vector.load %arg14[%c0_43, %c24] : memref<8x32xf32, #tpu.memory_space<vmem>>, vector<8x8xf32>
    tpu.vector_store %arg14[%c0_43, %c24], %92 {strides = array<i32>} : memref<8x32xf32, #tpu.memory_space<vmem>>, vector<8x8xf32>,
    %c0_44 = arith.constant 0 : index
    %c0_45 = arith.constant 0 : index
    %94 = vector.load %arg14[%c0_44, %c0_45] : memref<8x32xf32, #tpu.memory_space<vmem>>, vector<8x32xf32>
    %95 = arith.truncf %94 : vector<8x32xf32> to vector<8x32xbf16>
    %c0_46 = arith.constant 0 : index
    %c0_47 = arith.constant 0 : index
    %96 = vector.load %arg11[%c0_46, %c0_47] : memref<32x32xbf16, #tpu.memory_space<vmem>>, vector<32x32xbf16>
    %cst_48 = arith.constant dense<0.000000e+00> : vector<8x32xf32>
    %97 = tpu.matmul %95, %96, %cst_48 {dimension_numbers = #tpu.dot_dimension_numbers<[1], [0], [0], [1], [0, 0, 1, 1], [], []>} : vector<8x32xbf16>, vector<32x32xbf16>, vector<8x32xf32> -> vector<8x32xf32>
    %c0_49 = arith.constant 0 : index
    %c0_50 = arith.constant 0 : index
    %98 = vector.load %arg12[%c0_49, %c0_50] : memref<1x32xf32, #tpu.memory_space<vmem>>, vector<1x32xf32>
    %99 = vector.broadcast %98 : vector<1x32xf32> to vector<8x32xf32>
    %100 = arith.addf %97, %99 : vector<8x32xf32>
    %c0_51 = arith.constant 0 : index
    %c0_52 = arith.constant 0 : index
    %c0_53 = arith.constant 0 : index
    %101 = vector.load %arg13[%c0_51, %c0_52, %c0_53] : memref<1x8x32xf32, #tpu.memory_space<vmem>>, vector<1x8x32xf32>
    %102 = vector.shape_cast %101 : vector<1x8x32xf32> to vector<8x32xf32>
    %103 = vector.shape_cast %100 : vector<8x32xf32> to vector<1x8x32xf32>
    tpu.vector_store %arg13[%c0_51, %c0_52, %c0_53], %103 {strides = array<i32>} : memref<1x8x32xf32, #tpu.memory_space<vmem>>, vector<1x8x32xf32>,
    return
  }
  func.func @transform_0(%arg0: i32, %arg1: i32) -> (i32, i32, i32) {
    %c0_i32 = arith.constant 0 : i32
    %c0_i32_0 = arith.constant 0 : i32
    return %arg0, %arg1, %c0_i32 : i32, i32, i32
  }
  func.func @transform_1(%arg0: i32, %arg1: i32) -> (i32, i32, i32) {
    %c0_i32 = arith.constant 0 : i32
    %c0_i32_0 = arith.constant 0 : i32
    %c0_i32_1 = arith.constant 0 : i32
    return %arg0, %c0_i32, %c0_i32_0 : i32, i32, i32
  }
  func.func @transform_2(%arg0: i32, %arg1: i32) -> (i32, i32, i32) {
    %c0_i32 = arith.constant 0 : i32
    %c0_i32_0 = arith.constant 0 : i32
    %c0_i32_1 = arith.constant 0 : i32
    return %arg0, %c0_i32, %c0_i32_0 : i32, i32, i32
  }
  func.func @transform_3(%arg0: i32, %arg1: i32) -> (i32, i32) {
    %c0_i32 = arith.constant 0 : i32
    %c0_i32_0 = arith.constant 0 : i32
    %c0_i32_1 = arith.constant 0 : i32
    return %c0_i32, %c0_i32_0 : i32, i32
  }
  func.func @transform_4(%arg0: i32, %arg1: i32) -> (i32, i32) {
    %c0_i32 = arith.constant 0 : i32
    %c0_i32_0 = arith.constant 0 : i32
    %c0_i32_1 = arith.constant 0 : i32
    return %c0_i32, %c0_i32_0 : i32, i32
  }
  func.func @transform_5(%arg0: i32, %arg1: i32) -> (i32, i32) {
    %c0_i32 = arith.constant 0 : i32
    %c0_i32_0 = arith.constant 0 : i32
    %c0_i32_1 = arith.constant 0 : i32
    return %c0_i32, %c0_i32_0 : i32, i32
  }
  func.func @transform_6(%arg0: i32, %arg1: i32) -> (i32, i32) {
    %c0_i32 = arith.constant 0 : i32
    %c0_i32_0 = arith.constant 0 : i32
    %c0_i32_1 = arith.constant 0 : i32
    return %c0_i32, %c0_i32_0 : i32, i32
  }
  func.func @transform_7(%arg0: i32, %arg1: i32) -> (i32, i32) {
    %c0_i32 = arith.constant 0 : i32
    %c0_i32_0 = arith.constant 0 : i32
    %c0_i32_1 = arith.constant 0 : i32
    return %c0_i32, %c0_i32_0 : i32, i32
  }
  func.func @transform_8(%arg0: i32, %arg1: i32) -> (i32, i32) {
    %c0_i32 = arith.constant 0 : i32
    %c0_i32_0 = arith.constant 0 : i32
    %c0_i32_1 = arith.constant 0 : i32
    return %c0_i32, %c0_i32_0 : i32, i32
  }
  func.func @transform_9(%arg0: i32, %arg1: i32) -> (i32, i32) {
    %c0_i32 = arith.constant 0 : i32
    %c0_i32_0 = arith.constant 0 : i32
    %c0_i32_1 = arith.constant 0 : i32
    return %c0_i32, %c0_i32_0 : i32, i32
  }
  func.func @transform_10(%arg0: i32, %arg1: i32) -> (i32, i32) {
    %c0_i32 = arith.constant 0 : i32
    %c0_i32_0 = arith.constant 0 : i32
    %c0_i32_1 = arith.constant 0 : i32
    return %c0_i32, %c0_i32_0 : i32, i32
  }
  func.func @transform_11(%arg0: i32, %arg1: i32) -> (i32, i32, i32) {
    %c0_i32 = arith.constant 0 : i32
    %c0_i32_0 = arith.constant 0 : i32
    return %arg0, %arg1, %c0_i32 : i32, i32, i32
  }
}

</mosaic_0001>

<bundles_post_ra>
// kernel: tpu_custom_call.1
= control target key start
LH: loop header
LB: loop body
LE: loop exit
PB: predicated region body
PF: predicated region fallthrough
CT: control target
= control target key end

     0   :  { %s2948_s0 = inlined_call_operand.hbm [shape: bf16[2,8,32], index: 0, kind: input, shape index: {}]   ;;  %s2949_s1 = inlined_call_operand.hbm [shape: bf16[2,8,32], index: 1, kind: input, shape index: {}]   ;;  %s2950_s2 = inlined_call_operand.hbm [shape: bf16[2,8,32], index: 2, kind: input, shape index: {}]   ;;  %s2951_s3 = inlined_call_operand.hbm [shape: bf16[32,32], index: 3, kind: input, shape index: {}]   ;;  %s2952_s4 = inlined_call_operand.hbm [shape: f32[1,32], index: 4, kind: input, shape index: {}]   ;;  %s2953_s5 = inlined_call_operand.hbm [shape: bf16[32,32], index: 5, kind: input, shape index: {}]   ;;  %s2954_s6 = inlined_call_operand.hbm [shape: f32[1,32], index: 6, kind: input, shape index: {}]   ;;  %s2955_s7 = inlined_call_operand.hbm [shape: bf16[32,32], index: 7, kind: input, shape index: {}]   ;;  %s2956_s8 = inlined_call_operand.hbm [shape: f32[1,32], index: 8, kind: input, shape index: {}]   ;;  %s2957_s9 = inlined_call_operand.hbm [shape: bf16[32,32], index: 9, kind: input, shape index: {}]   ;;  %s2958_s10 = inlined_call_operand.hbm [shape: f32[1,32], index: 10, kind: input, shape index: {}]   ;;  %s2959_s11 = inlined_call_operand.hbm [shape: f32[2,8,32], index: 11, kind: output, shape index: {}]  }
   0x1   :  { %2981 = sst [smem:[#allocation35_spill]] %s2948_s0 }
   0x2   :  { %2982 = sst [smem:[#allocation36_spill]] %s2949_s1 }
   0x3   :  { %2983 = sst [smem:[#allocation37_spill]] %s2950_s2 }
   0x4   :  { %2984 = sst [smem:[#allocation38_spill]] %s2951_s3 }
   0x5   :  { %2985 = sst [smem:[#allocation39_spill]] %s2953_s5 }
   0x6   :  { %2986 = sst [smem:[#allocation40_spill]] %s2955_s7 }
   0x7   :  { %2987 = sst [smem:[#allocation41_spill]] %s2957_s9 }
   0x8   :  { %2988 = sst [smem:[#allocation42_spill]] %s2959_s11 }
   0x9   :  { %16 = vsyncpa [#allocation4], 0 }
   0xa   :  { %18 = vsyncpa [#allocation4 + $0x1], 0 }
   0xb   :  { %19 = vsyncpa [#allocation7], 0 }
   0xc   :  { %21 = vsyncpa [#allocation7 + $0x1], 0 }
   0xd   :  { %22 = vsyncpa [#allocation10], 0 }
   0xe   :  { %23 = vsyncpa [#allocation13], 0 }
   0xf   :  { %24 = vsyncpa [#allocation16], 0 }
  0x10   :  { %25 = vsyncpa [#allocation19], 0 }
  0x11   :  { %26 = vsyncpa [#allocation5], 0 }
  0x12   :  { %28 = vsyncpa [#allocation5 + $0x1], 0  ;;  %s2400_s17 = smov 0   ;;  %s2402_s18 = smov 0  }
  0x13   :  { %s2404_s19 = smov 0   ;;  %s2406_s20 = smov 0  }
  0x14   :  { %s2408_s21 = smov 0   ;;  %s2410_s22 = smov 0  }
  0x15 LB: > { %2989 = sst [smem:[#allocation29_spill]] %s2308_s20  ;;  %s2431_s23 = sadd.s32 4294967295, %s2316_s22   ;;  %s2316_s22 = sphi %s2410_s22, %s34_s22   ;;  %s2312_s21 = sphi %s2408_s21, %s3038_s21   ;;  %s2308_s20 = sphi %s2406_s20, %s3042_s20   ;;  %s2304_s19 = sphi %s2404_s19, %s3041_s19   ;;  %s2300_s18 = sphi %s2402_s18, %s3040_s18   ;;  %s2296_s17 = sphi %s2400_s17, %s3039_s17  }
  0x16   : > { %2990 = sst [smem:[#allocation30_spill]] %s2312_s21  ;;  %p1548_p0 = scmp.ge.s32.totalorder %s2316_s22, 1 }
  0x17   : > { %2991 = sst [smem:[#allocation31_spill]] %s2316_s22  ;;  %p2964_p1 = scmp.eq.s32.totalorder %s2431_s23, 0 }
  0x18   : > { %p327_p2 = scmp.lt.s32.totalorder %s2316_s22, 3  ;;  %s2318_s25 = smov [#allocation9]  }
  0x19   : > { %s339_s26 = sshll.u32 %s2318_s25, 4  ;;  %s2319_s28 = smov [#allocation12]   ;;  %s2440_s26 = int_to_ptr.vmem [resolvable:$true] %s339_s26 }
  0x1a   : > { %p2436_p3 = pnand %p1548_p0, %p327_p2  ;;  %s363_s29 = sshll.u32 %s2319_s28, 4  ;;  %s2451_s29 = int_to_ptr.vmem [resolvable:$true] %s363_s29 }
  0x1b   : > { %s2320_s30 = smov [#allocation15]   ;;  %s2995_s3 = sld [smem:[#allocation38_spill]] }
  0x1c   : > { %s2992_s24 = scalar_select %p2436_p3, 1, 0 }
  0x1d   : > { %p1753_p4 = pneg %p2436_p3  ;;  %s2453_s12 = sshll.u32 %s2320_s30, 4  ;;  %s388_s12 = int_to_ptr.vmem [resolvable:$true] %s2453_s12 }
  0x1e   : > { %2993 = sst [smem:[#allocation32_spill]] %s2992_s24 }
  0x1f   : > { %p2447_p6 = pnand %p1753_p4, %p2964_p1 }
  0x21   : > { %s2994_s27 = scalar_select %p2447_p6, 1, 0 }
  0x22   : > { %s1900_s15 = scalar_lea.hbm %s2995_s3, 256  ;;  %p2463_p8 = pneg %p2447_p6 }
  0x23   : > { %p1901_p7 = scmp.ne.s32.totalorder %s2995_s3, %s1900_s15  ;;  %p1907_p11 = scmp.lt.u32.totalorder %s1900_s15, %s2995_s3 }
  0x24   : > { %s2996_s11 = scalar_select %p2463_p8, 1, 0 }
  0x25   : > { %p1903_p9 = pnand %p2463_p8, %p1901_p7 }
  0x27   : > { %p1904_p10 = pneg %p1903_p9 }
  0x29   : > { %p1909_p12 = pnand %p1907_p11, %p1904_p10 }
  0x2b   : > { %1912 = shalt.err (!%p1909_p12)
}
  0x2c   : > { %s1913_s13 = scalar_lea.vmem %s2440_s26, 256  ;;  %p1921_p4 = scmp.lt.s32.totalorder %s2440_s26, %s2440_s26 }
  0x2d   : > { %p1914_p13 = scmp.ne.s32.totalorder %s2440_s26, %s1913_s13  ;;  %p1922_p5 = scmp.lt.s32.totalorder %s1913_s13, %s1913_s13 }
  0x2f   : > { %p1916_p0 = pnand %p1914_p13, %p2463_p8  ;;  %p1923_p7 = por %p1922_p5, %p1921_p4 }
  0x31   : > { %p1917_p2 = pneg %p1916_p0 }
  0x33   : > { %p1924_p9 = pnand %p1923_p7, %p1917_p2 }
  0x35   : > { %1927 = shalt.err (!%p1924_p9)
}
  0x36   : > { %s2321_s14 = smov 64   ;;  %s2322_s15 = smov 4  }
  0x37   : > { %1756 = dma.hbm_to_vmem [thread:$0]  (!%p2447_p6), %s2995_s3, 256, %s2440_s26, [#allocation10], %s2321_s14, %s2321_s14, %s2322_s15  }
  0x38   : > { %s2997_s5 = sld [smem:[#allocation39_spill]] }
  0x3e   : > { %s1928_s13 = scalar_lea.hbm %s2997_s5, 256 }
  0x3f   : > { %p1929_p5 = scmp.ne.s32.totalorder %s2997_s5, %s1928_s13  ;;  %p1935_p12 = scmp.lt.u32.totalorder %s1928_s13, %s2997_s5 }
  0x41   : > { %p1931_p10 = pnand %p1929_p5, %p2463_p8 }
  0x43   : > { %p1932_p11 = pneg %p1931_p10 }
  0x45   : > { %p1937_p13 = pnand %p1935_p12, %p1932_p11 }
  0x47   : > { %1940 = shalt.err (!%p1937_p13)
}
  0x48   : > { %s1941_s26 = scalar_lea.vmem %s2451_s29, 256  ;;  %p1949_p7 = scmp.lt.s32.totalorder %s2451_s29, %s2451_s29 }
  0x49   : > { %p1942_p0 = scmp.ne.s32.totalorder %s2451_s29, %s1941_s26  ;;  %p1950_p9 = scmp.lt.s32.totalorder %s1941_s26, %s1941_s26 }
  0x4b   : > { %p1944_p2 = pnand %p1942_p0, %p2463_p8  ;;  %p1951_p5 = por %p1950_p9, %p1949_p7 }
  0x4d   : > { %p1945_p4 = pneg %p1944_p2 }
  0x4f   : > { %p1952_p10 = pnand %p1951_p5, %p1945_p4 }
  0x51   : > { %1955 = shalt.err (!%p1952_p10)
}
  0x52   : > { %1762 = dma.hbm_to_vmem [thread:$0]  (!%p2447_p6), %s2997_s5, 256, %s2451_s29, [#allocation13], %s2321_s14, %s2321_s14, %s2322_s15  }
  0x53   : > { %s2998_s7 = sld [smem:[#allocation40_spill]] }
  0x59   : > { %s1956_s16 = scalar_lea.hbm %s2998_s7, 256 }
  0x5a   : > { %p1957_p11 = scmp.ne.s32.totalorder %s2998_s7, %s1956_s16  ;;  %p1963_p0 = scmp.lt.u32.totalorder %s1956_s16, %s2998_s7 }
  0x5c   : > { %p1959_p12 = pnand %p1957_p11, %p2463_p8 }
  0x5e   : > { %p1960_p13 = pneg %p1959_p12 }
  0x60   : > { %p1965_p2 = pnand %p1963_p0, %p1960_p13 }
  0x62   : > { %1968 = shalt.err (!%p1965_p2)
}
  0x63   : > { %s1969_s26 = scalar_lea.vmem %s388_s12, 256  ;;  %p1977_p5 = scmp.lt.s32.totalorder %s388_s12, %s388_s12 }
  0x64   : > { %p1970_p4 = scmp.ne.s32.totalorder %s388_s12, %s1969_s26  ;;  %p1978_p10 = scmp.lt.s32.totalorder %s1969_s26, %s1969_s26 }
  0x66   : > { %p1972_p7 = pnand %p1970_p4, %p2463_p8  ;;  %p1979_p1 = por %p1978_p10, %p1977_p5 }
  0x68   : > { %p1973_p9 = pneg %p1972_p7 }
  0x6a   : > { %p1980_p3 = pnand %p1979_p1, %p1973_p9 }
  0x6c   : > { %1983 = shalt.err (!%p1980_p3)
}
  0x6d   : > { %1768 = dma.hbm_to_vmem [thread:$0]  (!%p2447_p6), %s2998_s7, 256, %s388_s12, [#allocation16], %s2321_s14, %s2321_s14, %s2322_s15  }
  0x6e   : > { %s2323_s2 = smov [#allocation18]   ;;  %s2999_s9 = sld [smem:[#allocation41_spill]] }
  0x6f   : > { %s411_s20 = sshll.u32 %s2323_s2, 4  ;;  %s412_s20 = int_to_ptr.vmem [resolvable:$true] %s411_s20 }
  0x74   : > { %s1984_s25 = scalar_lea.hbm %s2999_s9, 256 }
  0x75   : > { %p1985_p1 = scmp.ne.s32.totalorder %s2999_s9, %s1984_s25  ;;  %p1991_p12 = scmp.lt.u32.totalorder %s1984_s25, %s2999_s9 }
  0x77   : > { %p1987_p3 = pnand %p1985_p1, %p2463_p8 }
  0x79   : > { %p1988_p11 = pneg %p1987_p3 }
  0x7b   : > { %p1993_p13 = pnand %p1991_p12, %p1988_p11 }
  0x7d   : > { %1996 = shalt.err (!%p1993_p13)
}
  0x7e   : > { %s1997_s12 = scalar_lea.vmem %s412_s20, 256  ;;  %p2005_p7 = scmp.lt.s32.totalorder %s412_s20, %s412_s20 }
  0x7f   : > { %p1998_p0 = scmp.ne.s32.totalorder %s412_s20, %s1997_s12  ;;  %p2006_p9 = scmp.lt.s32.totalorder %s1997_s12, %s1997_s12 }
  0x81   : > { %p2000_p2 = pnand %p1998_p0, %p2463_p8  ;;  %p2007_p5 = por %p2006_p9, %p2005_p7 }
  0x83   : > { %p2001_p4 = pneg %p2000_p2 }
  0x85   : > { %p2008_p10 = pnand %p2007_p5, %p2001_p4 }
  0x87   : > { %2011 = shalt.err (!%p2008_p10)
}
  0x88   : > { %1774 = dma.hbm_to_vmem [thread:$0]  (!%p2447_p6), %s2999_s9, 256, %s412_s20, [#allocation19], %s2321_s14, %s2321_s14, %s2322_s15  }
  0x89   : > { %s1547_s2 = sadd.s32 4294967294, %s2316_s22   ;;  %s46_s24 = sadd.s32 1, %s2312_s21 }
  0x8a   : > { %p48_p1 = scmp.ge.s32.totalorder %s46_s24, 2  ;;  %s55_s16 = sadd.s32 1, %s2304_s19 }
  0x8b   : > { %p62_p3 = scmp.ne.s32.totalorder %s2304_s19, %s2300_s18  ;;  %p63_p11 = scmp.eq.s32.totalorder %s2316_s22, 0 }
  0x8c   : > { %s3044_s24 = smov (%p48_p1, %s46_s24), 0  ;;  %p68_p13 = scmp.ne.s32.totalorder %s2300_s18, %s2296_s17 }
  0x8d   : > { %3000 = sst [smem:[#allocation33_spill]] %s3044_s24  ;;  %p2564_p12 = por %p63_p11, %p62_p3 }
  0x8e   : > { %s50_s14 = ssub.s32 %s2312_s21, %s3044_s24  ;;  %p314_p0 = scmp.eq.s32.totalorder %s2431_s23, 1 }
  0x8f   : > { %p53_p2 = scmp.eq.s32.totalorder %s50_s14, 0  ;;  %p3002_p4 = scmp.eq.s32.totalorder %s2431_s23, 0 }
  0x90   : > { %p2579_p9 = por %p314_p0, %p62_p3  ;;  %p320_p5 = scmp.eq.s32.totalorder %s1547_s2, 1 }
  0x91   : > { %p2575_p7 = por %p3002_p4, %p68_p13  ;;  %p1800_p1 = scmp.lt.s32.totalorder %s2316_s22, 2 }
  0x92   : > { %s3004_s20 = scalar_select %p2579_p9, 1, 0 }
  0x93   : > { %s3003_s15 = scalar_select %p2575_p7, 1, 0 }
  0x94   : > { %s2584_s28 = scalar_select %p53_p2, %s2304_s19, %s55_s16  }
  0x95   : > { %p2586_p10 = por %p320_p5, %p68_p13  ;;  %s2966_s13 = sand.u32 1, %s2304_s19  }
  0x96   : > { %3005 = sst [smem:[#allocation34_spill]] %s2584_s28  ;;  %s2593_s26 = sshll.u32 %s2312_s21, 6 }
  0x97   : > { %s3006_s30 = scalar_select %p2586_p10, 1, 0 }
  0x98   : > { %s2597_s12 = sshll.u32 %s2966_s13, 2  ;;  %p2601_p3 = pnand %p1800_p1, %p2564_p12 }
  0x99   : > { %s455_s0 = sand.u32 1, %s2316_s22   ;;  %s3008_s1 = sld [smem:[#allocation36_spill]] }
  0x9a   : > { %s3007_s29 = scalar_select %p2601_p3, 1, 0 }
  0x9b   : > { %s459_s3 = scalar_lea.vmem [#allocation6], %s2597_s12  ;;  %s2615_s25 = scalar_lea.sflag [#allocation7], %s455_s0 }
  0x9c   : > { %s466_s13 = sshll.u32 %s459_s3, 4  ;;  %p2621_p12 = pneg %p2601_p3  ;;  %s2613_s13 = int_to_ptr.vmem [resolvable:$true] %s466_s13 }
  0x9e   : > { %s3009_s7 = scalar_select %p2621_p12, 1, 0 }
  0x9f   : > { %s2610_s14 = scalar_lea.hbm %s3008_s1, %s2593_s26  ;;  %s2017_s9 = scalar_lea.hbm %s3008_s1, 128 }
  0xa0   : > { %s2012_s5 = scalar_lea.hbm %s2610_s14, 64  ;;  %p2018_p2 = scmp.lt.u32.totalorder %s2610_s14, %s3008_s1 }
  0xa1   : > { %p2013_p11 = scmp.ne.s32.totalorder %s2610_s14, %s2012_s5  ;;  %p2019_p4 = scmp.lt.u32.totalorder %s2017_s9, %s2012_s5 }
  0xa2   : > { %p2021_p1 = scmp.lt.u32.totalorder %s2012_s5, %s2610_s14 }
  0xa3   : > { %p2015_p13 = pnand %p2621_p12, %p2013_p11  ;;  %p2020_p5 = por %p2019_p4, %p2018_p2 }
  0xa5   : > { %p2016_p0 = pneg %p2015_p13  ;;  %p2022_p10 = por %p2021_p1, %p2020_p5 }
  0xa7   : > { %p2023_p9 = pnand %p2022_p10, %p2016_p0 }
  0xa9   : > { %2026 = shalt.err (!%p2023_p9)
}
  0xaa   : > { %s2027_s0 = scalar_lea.vmem %s2613_s13, 64  ;;  %s2324_s2 = smov [#allocation6]  }
  0xab   : > { %p2028_p11 = scmp.ne.s32.totalorder %s2613_s13, %s2027_s0  ;;  %s2032_s16 = sshll.u32 %s2324_s2, 4  ;;  %s2033_s16 = int_to_ptr.vmem [resolvable:$false] %s2032_s16 }
  0xac   : > { %s2034_s24 = scalar_lea.vmem %s2033_s16, 128  ;;  %p2035_p6 = scmp.lt.s32.totalorder %s2613_s13, %s2033_s16 }
  0xad   : > { %p2030_p13 = pnand %p2028_p11, %p2621_p12  ;;  %p2036_p8 = scmp.lt.s32.totalorder %s2034_s24, %s2027_s0 }
  0xaf   : > { %p2031_p7 = pneg %p2030_p13  ;;  %p2037_p2 = por %p2036_p8, %p2035_p6 }
  0xb1   : > { %p2038_p4 = pnand %p2037_p2, %p2031_p7 }
  0xb3   : > { %2041 = shalt.err (!%p2038_p4)
}
  0xb4   : > { %1784 = dma.hbm_to_vmem [thread:$0]  (!%p2601_p3), %s2610_s14, 64, %s2613_s13, %s2615_s25  }
  0xb5   : > { %s2325_s5 = smov [#allocation11]   ;;  %s2326_s3 = smov [#allocation14]  }
  0xb6   : > { %s353_s9 = sshll.u32 %s2325_s5, 4  ;;  %s377_s1 = sshll.u32 %s2326_s3, 4  ;;  %s354_s9 = int_to_ptr.vmem [resolvable:$true] %s353_s9  ;;  %s378_s1 = int_to_ptr.vmem [resolvable:$true] %s377_s1 }
  0xb7   : > { %s2042_s16 = scalar_lea.hbm %s2952_s4, 16  ;;  %p3010_p8 = scmp.ne.s32.totalorder %s2996_s11, 0 }
  0xb8   : > { %p2043_p6 = scmp.ne.s32.totalorder %s2952_s4, %s2042_s16  ;;  %p2049_p10 = scmp.lt.u32.totalorder %s2042_s16, %s2952_s4 }
  0xba   : > { %p2045_p7 = pnand %p2043_p6, %p3010_p8 }
  0xbc   : > { %p2046_p9 = pneg %p2045_p7 }
  0xbe   : > { %p2051_p0 = pnand %p2049_p10, %p2046_p9 }
  0xc0   : > { %2054 = shalt.err (!%p2051_p0)
}
  0xc1   : > { %s2055_s13 = scalar_lea.vmem %s354_s9, 16  ;;  %s2062_s21 = scalar_lea.vmem %s354_s9, 32 }
  0xc2   : > { %p2056_p5 = scmp.ne.s32.totalorder %s354_s9, %s2055_s13  ;;  %p2063_p13 = scmp.lt.s32.totalorder %s354_s9, %s354_s9 }
  0xc3   : > { %p2064_p2 = scmp.lt.s32.totalorder %s2062_s21, %s2055_s13 }
  0xc4   : > { %p2058_p1 = pnand %p2056_p5, %p3010_p8 }
  0xc5   : > { %p2065_p4 = por %p2064_p2, %p2063_p13 }
  0xc6   : > { %p2059_p11 = pneg %p2058_p1 }
  0xc8   : > { %p2066_p3 = pnand %p2065_p4, %p2059_p11 }
  0xca   : > { %2069 = shalt.err (!%p2066_p3)
}
  0xcb   : > { %p3011_p6 = scmp.ne.s32.totalorder %s2994_s27, 0  ;;  %s2070_s3 = scalar_lea.hbm %s2954_s6, 16 }
  0xcc   : > { %p2071_p7 = scmp.ne.s32.totalorder %s2954_s6, %s2070_s3  ;;  %p2077_p3 = scmp.lt.u32.totalorder %s2070_s3, %s2954_s6 }
  0xcd   : > { %1759 = dma.hbm_to_vmem [thread:$0]  (!%p3011_p6), %s2952_s4, 16, %s354_s9, [#allocation10]  }
  0xce   : > { %p2073_p9 = pnand %p2071_p7, %p3010_p8 }
  0xd0   : > { %p2074_p10 = pneg %p2073_p9 }
  0xd2   : > { %p2079_p0 = pnand %p2077_p3, %p2074_p10 }
  0xd4   : > { %2082 = shalt.err (!%p2079_p0)
}
  0xd5   : > { %s2083_s13 = scalar_lea.vmem %s378_s1, 16  ;;  %s2090_s9 = scalar_lea.vmem %s378_s1, 32 }
  0xd6   : > { %p2084_p5 = scmp.ne.s32.totalorder %s378_s1, %s2083_s13  ;;  %p2091_p13 = scmp.lt.s32.totalorder %s378_s1, %s378_s1 }
  0xd7   : > { %p2092_p2 = scmp.lt.s32.totalorder %s2090_s9, %s2083_s13 }
  0xd8   : > { %p2086_p1 = pnand %p2084_p5, %p3010_p8 }
  0xd9   : > { %p2093_p4 = por %p2092_p2, %p2091_p13 }
  0xda   : > { %p2087_p11 = pneg %p2086_p1 }
  0xdc   : > { %p2094_p12 = pnand %p2093_p4, %p2087_p11 }
  0xde   : > { %2097 = shalt.err (!%p2094_p12)
}
  0xdf   : > { %1765 = dma.hbm_to_vmem [thread:$0]  (!%p3011_p6), %s2954_s6, 16, %s378_s1, [#allocation13]  }
  0xe0   : > { %s2327_s5 = smov [#allocation17]   ;;  %s2328_s28 = smov [#allocation20]  }
  0xe1   : > { %s401_s22 = sshll.u32 %s2327_s5, 4  ;;  %s425_s3 = sshll.u32 %s2328_s28, 4  ;;  %s402_s22 = int_to_ptr.vmem [resolvable:$true] %s401_s22  ;;  %s426_s3 = int_to_ptr.vmem [resolvable:$true] %s425_s3 }
  0xe2   : > { %s2098_s0 = scalar_lea.hbm %s2956_s8, 16 }
  0xe3   : > { %p2099_p12 = scmp.ne.s32.totalorder %s2956_s8, %s2098_s0  ;;  %p2105_p10 = scmp.lt.u32.totalorder %s2098_s0, %s2956_s8 }
  0xe5   : > { %p2101_p7 = pnand %p2099_p12, %p3010_p8 }
  0xe7   : > { %p2102_p9 = pneg %p2101_p7 }
  0xe9   : > { %p2107_p3 = pnand %p2105_p10, %p2102_p9 }
  0xeb   : > { %2110 = shalt.err (!%p2107_p3)
}
  0xec   : > { %s2111_s1 = scalar_lea.vmem %s402_s22, 16  ;;  %s2118_s14 = scalar_lea.vmem %s402_s22, 32 }
  0xed   : > { %p2112_p0 = scmp.ne.s32.totalorder %s402_s22, %s2111_s1  ;;  %p2119_p11 = scmp.lt.s32.totalorder %s402_s22, %s402_s22 }
  0xee   : > { %p2120_p13 = scmp.lt.s32.totalorder %s2118_s14, %s2111_s1 }
  0xef   : > { %p2114_p5 = pnand %p2112_p0, %p3010_p8 }
  0xf0   : > { %p2121_p2 = por %p2120_p13, %p2119_p11 }
  0xf1   : > { %p2115_p1 = pneg %p2114_p5 }
  0xf3   : > { %p2122_p4 = pnand %p2121_p2, %p2115_p1 }
  0xf5   : > { %2125 = shalt.err (!%p2122_p4)
}
  0xf6   : > { %1771 = dma.hbm_to_vmem [thread:$0]  (!%p3011_p6), %s2956_s8, 16, %s402_s22, [#allocation16]  }
  0xf7   : > { %s2126_s0 = scalar_lea.hbm %s2958_s10, 16 }
  0xf8   : > { %p2127_p12 = scmp.ne.s32.totalorder %s2958_s10, %s2126_s0  ;;  %p2133_p10 = scmp.lt.u32.totalorder %s2126_s0, %s2958_s10 }
  0xfa   : > { %p2129_p7 = pnand %p2127_p12, %p3010_p8 }
  0xfc   : > { %p2130_p9 = pneg %p2129_p7 }
  0xfe   : > { %p2135_p3 = pnand %p2133_p10, %p2130_p9 }
 0x100   : > { %2138 = shalt.err (!%p2135_p3)
}
 0x101   : > { %s2139_s1 = scalar_lea.vmem %s426_s3, 16  ;;  %s2146_s22 = scalar_lea.vmem %s426_s3, 32 }
 0x102   : > { %p2140_p0 = scmp.ne.s32.totalorder %s426_s3, %s2139_s1  ;;  %p2147_p11 = scmp.lt.s32.totalorder %s426_s3, %s426_s3 }
 0x103   : > { %p2148_p13 = scmp.lt.s32.totalorder %s2146_s22, %s2139_s1 }
 0x104   : > { %p2142_p5 = pnand %p2140_p0, %p3010_p8 }
 0x105   : > { %p2149_p2 = por %p2148_p13, %p2147_p11 }
 0x106   : > { %p2143_p1 = pneg %p2142_p5 }
 0x108   : > { %p2150_p4 = pnand %p2149_p2, %p2143_p1 }
 0x10a   : > { %2153 = shalt.err (!%p2150_p4)
}
 0x10b   : > { %1777 = dma.hbm_to_vmem [thread:$0]  (!%p3011_p6), %s2958_s10, 16, %s426_s3, [#allocation19]  }
 0x10c   : > { %s3012_s2 = sld [smem:[#allocation35_spill]]  ;;  %s440_s0 = scalar_lea.vmem [#allocation3], %s2597_s12 }
 0x10d   : > { %s448_s27 = sshll.u32 %s440_s0, 4  ;;  %s3013_s9 = sld [smem:[#allocation37_spill]]  ;;  %s2724_s27 = int_to_ptr.vmem [resolvable:$true] %s448_s27 }
 0x10e   : > { %s3014_s1 = sand.u32 1, %s2304_s19   ;;  %p3015_p6 = scmp.ne.s32.totalorder %s3009_s7, 0 }
 0x10f   : > { %s437_s3 = scalar_lea.sflag [#allocation4], %s3014_s1 }
 0x112   : > { %s2721_s16 = scalar_lea.hbm %s3012_s2, %s2593_s26  ;;  %s2159_s11 = scalar_lea.hbm %s3012_s2, 128 }
 0x113   : > { %s2730_s21 = scalar_lea.hbm %s3013_s9, %s2593_s26  ;;  %s2154_s22 = scalar_lea.hbm %s2721_s16, 64 }
 0x114   : > { %p2155_p8 = scmp.ne.s32.totalorder %s2721_s16, %s2154_s22  ;;  %p2160_p9 = scmp.lt.u32.totalorder %s2721_s16, %s3012_s2 }
 0x115   : > { %p2161_p10 = scmp.lt.u32.totalorder %s2159_s11, %s2154_s22  ;;  %p2163_p0 = scmp.lt.u32.totalorder %s2154_s22, %s2721_s16 }
 0x116   : > { %p2157_p12 = pnand %p2155_p8, %p3015_p6 }
 0x117   : > { %p2162_p3 = por %p2161_p10, %p2160_p9 }
 0x118   : > { %p2158_p7 = pneg %p2157_p12 }
 0x119   : > { %p2164_p5 = por %p2163_p0, %p2162_p3 }
 0x11b   : > { %p2165_p1 = pnand %p2164_p5, %p2158_p7 }
 0x11d   : > { %2168 = shalt.err (!%p2165_p1)
}
 0x11e   : > { %s2169_s26 = scalar_lea.vmem %s2724_s27, 64  ;;  %s2329_s24 = smov [#allocation3]  }
 0x11f   : > { %p2170_p11 = scmp.ne.s32.totalorder %s2724_s27, %s2169_s26  ;;  %s2174_s13 = sshll.u32 %s2329_s24, 4  ;;  %s2175_s13 = int_to_ptr.vmem [resolvable:$false] %s2174_s13 }
 0x120   : > { %s2176_s1 = scalar_lea.vmem %s2175_s13, 128  ;;  %p2177_p4 = scmp.lt.s32.totalorder %s2724_s27, %s2175_s13 }
 0x121   : > { %p2172_p13 = pnand %p2170_p11, %p3015_p6  ;;  %p2178_p8 = scmp.lt.s32.totalorder %s2176_s1, %s2169_s26 }
 0x123   : > { %p2173_p2 = pneg %p2172_p13  ;;  %p2179_p12 = por %p2178_p8, %p2177_p4 }
 0x125   : > { %p2180_p9 = pnand %p2179_p12, %p2173_p2 }
 0x127   : > { %2183 = shalt.err (!%p2180_p9)
}
 0x128   : > { %p3016_p7 = scmp.ne.s32.totalorder %s3007_s29, 0  ;;  %s477_s22 = scalar_lea.vmem [#allocation8], %s2597_s12 }
 0x129   : > { %s484_s14 = sshll.u32 %s477_s22, 4  ;;  %s2184_s5 = scalar_lea.hbm %s2730_s21, 64  ;;  %s485_s14 = int_to_ptr.vmem [resolvable:$true] %s484_s14 }
 0x12a   : > { %1781 = dma.hbm_to_vmem [thread:$0]  (!%p3016_p7), %s2721_s16, 64, %s2724_s27, %s437_s3  }
 0x12b   : > { %p2185_p10 = scmp.ne.s32.totalorder %s2730_s21, %s2184_s5  ;;  %s2189_s0 = scalar_lea.hbm %s3013_s9, 128 }
 0x12c   : > { %p2190_p5 = scmp.lt.u32.totalorder %s2730_s21, %s3013_s9  ;;  %p2191_p1 = scmp.lt.u32.totalorder %s2189_s0, %s2184_s5 }
 0x12d   : > { %p2187_p3 = pnand %p2185_p10, %p3015_p6  ;;  %p2193_p13 = scmp.lt.u32.totalorder %s2184_s5, %s2730_s21 }
 0x12e   : > { %p2192_p11 = por %p2191_p1, %p2190_p5 }
 0x12f   : > { %p2188_p0 = pneg %p2187_p3 }
 0x130   : > { %p2194_p2 = por %p2193_p13, %p2192_p11 }
 0x132   : > { %p2195_p4 = pnand %p2194_p2, %p2188_p0 }
 0x134   : > { %2198 = shalt.err (!%p2195_p4)
}
 0x135   : > { %s2199_s12 = scalar_lea.vmem %s485_s14, 64  ;;  %s2330_s16 = smov [#allocation8]  }
 0x136   : > { %p2200_p8 = scmp.ne.s32.totalorder %s485_s14, %s2199_s12  ;;  %s2204_s27 = sshll.u32 %s2330_s16, 4  ;;  %s2205_s27 = int_to_ptr.vmem [resolvable:$false] %s2204_s27 }
 0x137   : > { %s2206_s3 = scalar_lea.vmem %s2205_s27, 128  ;;  %p2207_p10 = scmp.lt.s32.totalorder %s485_s14, %s2205_s27 }
 0x138   : > { %p2202_p12 = pnand %p2200_p8, %p3015_p6  ;;  %p2208_p3 = scmp.lt.s32.totalorder %s2206_s3, %s2199_s12 }
 0x13a   : > { %p2203_p9 = pneg %p2202_p12  ;;  %p2209_p7 = por %p2208_p3, %p2207_p10 }
 0x13c   : > { %p2210_p1 = pnand %p2209_p7, %p2203_p9 }
 0x13e   : > { %2213 = shalt.err (!%p2210_p1)
}
 0x13f   : > { %p3017_p5 = scmp.ne.s32.totalorder %s3007_s29, 0  ;;  %s3018_s13 = sld [smem:[#allocation32_spill]] }
 0x141   : > { %1787 = dma.hbm_to_vmem [thread:$0]  (!%p3017_p5), %s2730_s21, 64, %s485_s14, %s2615_s25  }
 0x145   : > { %p3019_p0 = scmp.ne.s32.totalorder %s3018_s13, 0 }
 0x146   : > { %s2777_s7 = sand.u32 (!%p3019_p0), 1, %s2300_s18   ;;  %p3020_p6 = scmp.ne.s32.totalorder (!%p3019_p0), %s3003_s15, 0 }
 0x147   : > { %493 = sbr.rel (%p3019_p0) target bundleno = 1810 (0x712), region = 64  ;;  %s2780_s1 = sshll.u32 (!%p3019_p0), %s2777_s7, 2 }
 0x148   : > { %s496_s22 = scalar_lea.sflag (!%p3019_p0), [#allocation4], %s2777_s7  ;;  %s499_s5 = scalar_lea.vmem (!%p3019_p0), [#allocation3], %s2780_s1 }
 0x14e   : > { %2267 = dma.done.wait (%p3020_p6), %s496_s22, 64  }
 0x14f   : > { %2269 = vsyncadd (%p3020_p6), %s496_s22, 4294967232  ;;  %s504_s29 = sand.u32 1, %s2431_s23   ;;  %s508_s21 = scalar_lea.vmem [#allocation6], %s2780_s1 }
 0x150   : > { %s505_s25 = scalar_lea.sflag [#allocation7], %s504_s29 }
 0x151   : > { %2271 = dma.done.wait (%p3020_p6), %s505_s25, 128  }
 0x152   : > { %2273 = vsyncadd (%p3020_p6), %s505_s25, 4294967168  ;;  %s517_s14 = scalar_lea.vmem [#allocation8], %s2780_s1  ;;  %p3021_p7 = scmp.eq.s32.totalorder %s2431_s23, 0 }
 0x154   : > { %2275 = dma.done.wait (%p3021_p7), [#allocation10], 272   ;;  %p3022_p11 = pmov %p3021_p7 }
 0x155   : > { %p3023_p13 = pmov %p3021_p7 }
 0x156   : > { %2277 = vsyncadd (%p3022_p11), [#allocation10], 4294967024 }
 0x157   : > { %2279 = dma.done.wait (%p3023_p13), [#allocation13], 272   ;;  %p3024_p2 = pmov %p3021_p7 }
 0x159   : > { %2281 = vsyncadd (%p3024_p2), [#allocation13], 4294967024  ;;  %p3025_p4 = pmov %p3024_p2 }
 0x15a   : > { %p3026_p8 = pmov %p3024_p2 }
 0x15b   : > { %2283 = dma.done.wait (%p3025_p4), [#allocation16], 272  }
 0x15c   : > { %2285 = vsyncadd (%p3026_p8), [#allocation16], 4294967024  ;;  %p3027_p12 = pmov %p3024_p2 }
 0x15d   : > { %p3028_p9 = pmov %p3024_p2 }
 0x15e   : > { %2287 = dma.done.wait (%p3027_p12), [#allocation19], 272  }
 0x15f   : > { %2289 = vsyncadd (%p3028_p9), [#allocation19], 4294967024  ;;  %v2331_v0 = vmov 0.0   ;;  %vm2332_vm0 = vmmov 0   ;;  %v1876_v1 = vld [vmem:[#allocation12] sm:$0xff]   ;;  %v1877_v2 = vld [vmem:[#allocation9] sm:$0xff]  }
 0x160   : > { %1641 = vmatprep.subr.bf16.mxu1 %v2331_v0  ;;  %1633 = vmatprep.subr.bf16.mxu0 %v2331_v0  ;;  %v1878_v3 = vld [vmem:[#allocation12 + $0x8] sm:$0xff]   ;;  %v1879_v4 = vld [vmem:[#allocation9 + $0x8] sm:$0xff]   ;;  %v600_v5 = vld [vmem:[%s508_s21] sm:$0xf]  ;;  %vm625_vm1 = vcmask 261120   ;;  %vm805_vm2 = vcmask 64512  }
 0x161   : > { %1645 = vmatprep.mubr.msk.bf16.mxu1 %vm2332_vm0, %v2331_v0  ;;  %1637 = vmatprep.mubr.msk.bf16.mxu0 %vm2332_vm0, %v2331_v0  ;;  %v599_v6 = vld [vmem:[%s499_s5] sm:$0xf]  ;;  %v1581_v7 = vld [vmem:[#allocation14] ss:$0 sm:$0xff]  ;;  %v1577_v8 = vld [vmem:[#allocation11] ss:$0 sm:$0xff] }
 0x162   : > { %1642 = vmatpush3.bf16.msra.mxu1 %v1876_v1  ;;  %1634 = vmatpush3.bf16.msra.mxu0 %v1877_v2  ;;  %s2333_s23 = smov 112   ;;  %s2334_s15 = smov 120   ;;  %v1880_v23 = vld [vmem:[#allocation15] sm:$0xff]   ;;  %v1881_v24 = vld [vmem:[#allocation15 + $0x8] sm:$0xff]   ;;  %v601_v25 = vld [vmem:[%s517_s14] sm:$0xf] }
 0x163   : > { %1643 = vmatprep.subr.bf16.mxu1 %v2331_v0  ;;  %1635 = vmatprep.subr.bf16.mxu0 %v2331_v0  ;;  %s2335_s11 = smov 104   ;;  %v1585_v40 = vld [vmem:[#allocation17] ss:$0 sm:$0xff]  ;;  %vm867_vm3 = vcmask 1043456   ;;  %s2336_s28 = smov 8   ;;  %vm1029_vm4 = vcmask 130112  }
 0x164   : > { %s2337_s0 = smov 16   ;;  %s2338_s26 = smov 24   ;;  %vm1145_vm5 = vcmask 195712   ;;  %vm1261_vm6 = vcmask 261312  }
 0x165   : > { %s3029_s24 = sld [smem:[#allocation29_spill]]  ;;  %s1576_s12 = sshll.u32 %s2777_s7, 3 }
 0x166   : > { %1644 = vmatpush3.bf16.msra.mxu1 %v1878_v3  ;;  %1636 = vmatpush3.bf16.msra.mxu0 %v1879_v4  ;;  %s597_s27 = scalar_lea.vmem [#allocation21], %s1576_s12  ;;  %s3030_s22 = sld [smem:[#allocation42_spill]] }
 0x167   : > { %1657 = vmatprep.subr.bf16.mxu1 %v2331_v0  ;;  %1649 = vmatprep.subr.bf16.mxu0 %v2331_v0  ;;  %s1347_s3 = sshll.u32 %s597_s27, 4  ;;  %s1333_s25 = scalar_lea.sflag [#allocation5], %s2777_s7  ;;  %s2900_s3 = int_to_ptr.vmem [resolvable:$true] %s1347_s3 }
 0x168   : > { %s2214_s21 = scalar_lea.vmem %s2900_s3, 128  ;;  %p3032_p3 = scmp.ne.s32.totalorder %s3004_s20, 0 }
 0x169   : > { %1646 = vmatmul.mubr.msk.bf16.vlgmr.msra.gmra.mrb[0].mxu1 %vm625_vm1, %v600_v5  ;;  %1638 = vmatmul.mubr.msk.bf16.vlgmr.msra.gmra.mrb[0].mxu0 %vm625_vm1, %v599_v6  ;;  %p2215_p10 = scmp.ne.s32.totalorder %s2900_s3, %s2214_s21  ;;  %s2339_s14 = smov [#allocation21]  }
 0x16a   : > { %1659 = vmatprep.mubr.msk.bf16.mxu1 %vm2332_vm0, %v2331_v0  ;;  %1653 = vmatprep.mubr.msk.bf16.mxu0 %vm2332_vm0, %v2331_v0 }
 0x16b   : > { %1650 = vmatpush3.bf16.msra.mxu0 %v1880_v23  ;;  %s1602_s16 = sshll.u32 %s3029_s24, 7  ;;  %p2216_p1 = pnand %p2215_p10, %p3032_p3 }
 0x16c   : > { %1651 = vmatprep.subr.bf16.mxu0 %v2331_v0  ;;  %s3031_s5 = smov %s3030_s22  ;;  %s2898_s29 = scalar_lea.hbm %s3030_s22, %s1602_s16 }
 0x16d   : > { %p2217_p5 = pneg %p2216_p1 }
 0x16f   : > { %1652 = vmatpush3.bf16.msra.mxu0 %v1881_v24 }
 0x170   : > { %1663 = vmatprep.subr.bf16.mxu0 %v2331_v0 }
 0x172   : > { %1654 = vmatmul.mubr.msk.bf16.vlgmr.msra.gmra.mrb[4].mxu0 %vm625_vm1, %v601_v25 }
 0x173   : > { %1665 = vmatprep.mubr.msk.bf16.mxu0 %vm2332_vm0, %v2331_v0 }
 0x23c   : > { %v729_v9 = vpop.f32.mrb[0].mxu1  ;;  %v663_v12 = vpop.f32.mrb[0].mxu0 }
 0x23d   : > { %v730_v10 = vadd.f32 %v1581_v7, %v729_v9  ;;  %v1647_v11 = vpop.f32.mrb[1].mxu1  ;;  %v664_v13 = vadd.f32 %v1577_v8, %v663_v12  ;;  %v1639_v15 = vpop.f32.mrb[1].mxu0 }
 0x23e   : > { %v732_v14 = vpop.f32.mrb[2].mxu1  ;;  %v666_v18 = vpop.f32.mrb[2].mxu0 }
 0x23f   : > { %v803_v16 = vpack.c.bf16 %v730_v10, %v730_v10  ;;  %v1648_v17 = vpop.f32.mrb[3].mxu1  ;;  %v801_v19 = vmul.f32 0.35355338, %v664_v13  ;;  %v1640_v20 = vpop.f32.mrb[3].mxu0 }
 0x241   : > { %1033 = vrot.lane.b32.xlu1 %v803_v16, %s2333_s23  ;;  %916 = vrot.lane.b32.xlu0 %v803_v16, %s2334_s15  ;;  %v810_v21 = vsel %vm805_vm2, %v803_v16, 0  ;;  %v802_v22 = vpack.c.bf16 %v801_v19, %v801_v19 }
 0x242   : > { %1658 = vmatpush3.bf16.xpose.msra.mxu1 %v810_v21 }
 0x243   : > { %1669 = vmatprep.subr.bf16.mxu1 %v2331_v0 }
 0x245   : > { %1031 = vrot.lane.b32.xlu1 %v802_v22, %s2333_s23  ;;  %913 = vrot.lane.b32.xlu0 %v802_v22, %s2334_s15  ;;  %v795_v41 = vpop.f32.mrb[4].mxu0 }
 0x246   : > { %v796_v42 = vadd.f32 %v1585_v40, %v795_v41  ;;  %v1655_v43 = vpop.f32.mrb[5].mxu0 }
 0x247   : > { %v798_v44 = vpop.f32.mrb[6].mxu0 }
 0x248   : > { %v804_v45 = vpack.c.bf16 %v796_v42, %v796_v42  ;;  %v1656_v46 = vpop.f32.mrb[7].mxu0 }
 0x249   : > { %1147 = vrot.lane.b32.xlu1 %v802_v22, %s2335_s11  ;;  %1149 = vrot.lane.b32.xlu0 %v803_v16, %s2335_s11 }
 0x24a   : > { %1660 = vmatmul.mubr.msk.bf16.vlgmr.msra.gmra.mrb[4].mxu1 %vm805_vm2, %v802_v22  ;;  %v869_v47 = vsel %vm867_vm3, %v804_v45, 0 }
 0x24b   : > { %1671 = vmatprep.mubr.msk.bf16.mxu1 %vm2332_vm0, %v2331_v0  ;;  %1664 = vmatpush3.bf16.msra.mxu0 %v869_v47 }
 0x24c   : > { %1675 = vmatprep.subr.bf16.mxu0 %v2331_v0 }
 0x2b3   : > { %v917_v26 = vpop.permute.xlu0 %916  ;;  %v1034_v28 = vpop.permute.xlu1 %1033 }
 0x2b4   : > { %v922_v27 = vsel %vm805_vm2, %v917_v26, 0  ;;  %v1039_v30 = vsel %vm805_vm2, %v1034_v28, 0 }
 0x2b5   : > { %1670 = vmatpush3.bf16.xpose.msra.mxu1 %v922_v27 }
 0x2b6   : > { %1681 = vmatprep.subr.bf16.mxu1 %v2331_v0 }
 0x2b7   : > { %v914_v29 = vpop.permute.xlu0 %913  ;;  %v1032_v32 = vpop.permute.xlu1 %1031 }
 0x2bb   : > { %v1150_v31 = vpop.permute.xlu0 %1149  ;;  %v1148_v34 = vpop.permute.xlu1 %1147 }
 0x2bc   : > { %1672 = vmatmul.mubr.msk.bf16.vlgmr.msra.gmra.mrb[8].mxu1 %vm805_vm2, %v914_v29  ;;  %v1155_v33 = vsel %vm805_vm2, %v1150_v31, 0 }
 0x2bd   : > { %1682 = vmatpush3.bf16.xpose.msra.mxu1 %v1039_v30  ;;  %1683 = vmatprep.mubr.msk.bf16.mxu1 %vm2332_vm0, %v2331_v0 }
 0x2be   : > { %1693 = vmatprep.subr.bf16.mxu1 %v2331_v0 }
 0x2c4   : > { %1684 = vmatmul.mubr.msk.bf16.vlgmr.msra.gmra.mrb[12].mxu1 %vm805_vm2, %v1032_v32 }
 0x2c5   : > { %1694 = vmatpush3.bf16.xpose.msra.mxu1 %v1155_v33  ;;  %1695 = vmatprep.mubr.msk.bf16.mxu1 %vm2332_vm0, %v2331_v0 }
 0x2c6   : > { %1705 = vmatprep.subr.bf16.mxu1 %v2331_v0 }
 0x2cc   : > { %1696 = vmatmul.mubr.msk.bf16.vlgmr.msra.gmra.mrb[16].mxu1 %vm805_vm2, %v1148_v34 }
 0x2cd   : > { %1709 = vmatprep.mubr.msk.bf16.mxu1 %vm2332_vm0, %v2331_v0 }
 0x31d   : > { %v846_v35 = vpop.f32.mrb[4].mxu1 }
 0x31e   : > { %v1661_v36 = vpop.f32.mrb[5].mxu1  ;;  %v852_v37 = vsel %vm805_vm2, %v846_v35, -inf }
 0x31f   : > { %853 = vmax.xlane.f32.xlu0 %v852_v37  ;;  %v849_v38 = vpop.f32.mrb[6].mxu1 }
 0x320   : > { %v1662_v39 = vpop.f32.mrb[7].mxu1 }
 0x38f   : > { %v958_v48 = vpop.f32.mrb[8].mxu1 }
 0x390   : > { %v1673_v49 = vpop.f32.mrb[9].mxu1  ;;  %v964_v50 = vsel %vm805_vm2, %v958_v48, -inf }
 0x391   : > { %965 = vmax.xlane.f32.xlu1 %v964_v50  ;;  %v961_v51 = vpop.f32.mrb[10].mxu1  ;;  %v1882_v50 = vld [vmem:[#allocation18] sm:$0xff]  }
 0x392   : > { %v1674_v52 = vpop.f32.mrb[11].mxu1  ;;  %1706 = vmatpush3.bf16.msra.mxu1 %v1882_v50  ;;  %v1883_v51 = vld [vmem:[#allocation18 + $0x8] sm:$0xff]  }
 0x393   : > { %1707 = vmatprep.subr.bf16.mxu1 %v2331_v0 }
 0x396   : > { %1708 = vmatpush3.bf16.msra.mxu1 %v1883_v51 }
 0x397   : > { %v1075_v53 = vpop.f32.mrb[12].mxu1 }
 0x398   : > { %v1685_v54 = vpop.f32.mrb[13].mxu1  ;;  %v1081_v55 = vsel %vm805_vm2, %v1075_v53, -inf }
 0x399   : > { %1082 = vmax.xlane.f32.xlu0 %v1081_v55  ;;  %v1078_v56 = vpop.f32.mrb[14].mxu1 }
 0x39a   : > { %v1686_v57 = vpop.f32.mrb[15].mxu1 }
 0x39f   : > { %v1191_v58 = vpop.f32.mrb[16].mxu1 }
 0x3a0   : > { %v1697_v59 = vpop.f32.mrb[17].mxu1  ;;  %v1197_v60 = vsel %vm805_vm2, %v1191_v58, -inf }
 0x3a1   : > { %1198 = vmax.xlane.f32.xlu0 %v1197_v60  ;;  %v1194_v61 = vpop.f32.mrb[18].mxu1 }
 0x3a2   : > { %v1698_v62 = vpop.f32.mrb[19].mxu1 }
 0x3ac   : > { %v854_v63 = vpop.xlane.xlu0 %853 }
 0x3ad   : > { %v855_v1 = vsub.f32 %v846_v35, %v854_v63 }
 0x3af   : > { %v856_v2 = vmul.f32 1.442695, %v855_v1  ;;  %v1597_v1 = vld [vmem:[#allocation20] ss:$0 sm:$0xff] }
 0x3b1   : > { %1884 = vpow2.f32 %v856_v2 }
 0x3bb   : > { %v1885_v3 = vpop.eup %1884 }
 0x3bc   : > { %v858_v4 = vsel %vm805_vm2, %v1885_v3, 0.0 }
 0x3bd   : > { %859 = vadd.xlane.f32.xlu1 %v858_v4 }
 0x3ce   : > { %977 = vrot.lane.b32.xlu1 %v804_v45, %s2334_s15 }
 0x41e   : > { %v966_v5 = vpop.xlane.xlu1 %965 }
 0x41f   : > { %v967_v6 = vsub.f32 %v958_v48, %v966_v5 }
 0x421   : > { %v968_v7 = vmul.f32 1.442695, %v967_v6 }
 0x423   : > { %1886 = vpow2.f32 %v968_v7 }
 0x426   : > { %v1083_v8 = vpop.xlane.xlu0 %1082 }
 0x427   : > { %v1084_v9 = vsub.f32 %v1075_v53, %v1083_v8 }
 0x429   : > { %v1085_v10 = vmul.f32 1.442695, %v1084_v9 }
 0x42b   : > { %1888 = vpow2.f32 %v1085_v10 }
 0x42d   : > { %v1887_v11 = vpop.eup %1886 }
 0x42e   : > { %v1199_v12 = vpop.xlane.xlu0 %1198  ;;  %v970_v13 = vsel %vm805_vm2, %v1887_v11, 0.0 }
 0x42f   : > { %v1200_v14 = vsub.f32 %v1191_v58, %v1199_v12  ;;  %971 = vadd.xlane.f32.xlu0 %v970_v13 }
 0x431   : > { %v1201_v15 = vmul.f32 1.442695, %v1200_v14 }
 0x433   : > { %1890 = vpow2.f32 %v1201_v15 }
 0x435   : > { %v1889_v16 = vpop.eup %1888 }
 0x436   : > { %v1087_v17 = vsel %vm805_vm2, %v1889_v16, 0.0 }
 0x437   : > { %1088 = vadd.xlane.f32.xlu1 %v1087_v17 }
 0x43d   : > { %v1891_v18 = vpop.eup %1890 }
 0x43e   : > { %v1203_v19 = vsel %vm805_vm2, %v1891_v18, 0.0 }
 0x43f   : > { %1204 = vadd.xlane.f32.xlu0 %v1203_v19 }
 0x448   : > { %1209 = vrot.lane.b32.xlu1 %v804_v45, %s2335_s11 }
 0x44a   : > { %v860_v20 = vpop.xlane.xlu1 %859 }
 0x44b   : > { %1892 = vrcp.f32 %v860_v20 }
 0x44e   : > { %v978_v22 = vpop.permute.xlu1 %977 }
 0x44f   : > { %v983_v25 = vsel %vm867_vm3, %v978_v22, 0 }
 0x455   : > { %v1893_v21 = vpop.eup %1892  ;;  %1093 = vrot.lane.b32.xlu0 %v804_v45, %s2333_s23  ;;  %s2218_s23 = sshll.u32 %s2339_s14, 4  ;;  %s2219_s23 = int_to_ptr.vmem [resolvable:$false] %s2218_s23 }
 0x456   : > { %v862_v23 = vmul.f32 %v1893_v21, %v1885_v3  ;;  %s2220_s15 = scalar_lea.vmem %s2219_s23, 256  ;;  %p2221_p0 = scmp.lt.s32.totalorder %s2900_s3, %s2219_s23 }
 0x457   : > { %p2222_p6 = scmp.lt.s32.totalorder %s2220_s15, %s2214_s21 }
 0x458   : > { %v863_v24 = vpack.c.bf16 %v862_v23, %v862_v23 }
 0x459   : > { %p2223_p7 = por %p2222_p6, %p2221_p0 }
 0x45a   : > { %1666 = vmatmul.mubr.msk.bf16.vlgmr.msra.gmra.mrb[8].mxu0 %vm805_vm2, %v863_v24 }
 0x45b   : > { %1676 = vmatpush3.bf16.msra.mxu0 %v983_v25  ;;  %1677 = vmatprep.mubr.msk.bf16.mxu0 %vm2332_vm0, %v2331_v0  ;;  %p2224_p11 = pnand %p2223_p7, %p2217_p5 }
 0x45c   : > { %1687 = vmatprep.subr.bf16.mxu0 %v2331_v0 }
 0x4bc   : > { %v972_v26 = vpop.xlane.xlu0 %971 }
 0x4bd   : > { %1894 = vrcp.f32 %v972_v26 }
 0x4c4   : > { %v1089_v27 = vpop.xlane.xlu1 %1088 }
 0x4c5   : > { %1896 = vrcp.f32 %v1089_v27 }
 0x4c7   : > { %v1895_v28 = vpop.eup %1894 }
 0x4c8   : > { %v974_v29 = vmul.f32 %v1895_v28, %v1887_v11  ;;  %v1210_v36 = vpop.permute.xlu1 %1209 }
 0x4c9   : > { %v1215_v38 = vsel %vm867_vm3, %v1210_v36, 0 }
 0x4ca   : > { %v975_v30 = vpack.c.bf16 %v974_v29, %v974_v29 }
 0x4cc   : > { %v1205_v31 = vpop.xlane.xlu0 %1204  ;;  %1678 = vmatmul.mubr.msk.bf16.vlgmr.msra.gmra.mrb[12].mxu0 %vm805_vm2, %v975_v30 }
 0x4cd   : > { %1898 = vrcp.f32 %v1205_v31  ;;  %1689 = vmatprep.mubr.msk.bf16.mxu0 %vm2332_vm0, %v2331_v0 }
 0x4cf   : > { %v1897_v32 = vpop.eup %1896 }
 0x4d0   : > { %v1091_v33 = vmul.f32 %v1897_v32, %v1889_v16  ;;  %v1094_v34 = vpop.permute.xlu0 %1093 }
 0x4d1   : > { %v1099_v35 = vsel %vm867_vm3, %v1094_v34, 0 }
 0x4d2   : > { %1688 = vmatpush3.bf16.msra.mxu0 %v1099_v35  ;;  %v1092_v37 = vpack.c.bf16 %v1091_v33, %v1091_v33 }
 0x4d3   : > { %1699 = vmatprep.subr.bf16.mxu0 %v2331_v0 }
 0x4d5   : > { %1690 = vmatmul.mubr.msk.bf16.vlgmr.msra.gmra.mrb[16].mxu0 %vm805_vm2, %v1092_v37 }
 0x4d6   : > { %1700 = vmatpush3.bf16.msra.mxu0 %v1215_v38  ;;  %1701 = vmatprep.mubr.msk.bf16.mxu0 %vm2332_vm0, %v2331_v0 }
 0x4d7   : > { %v1899_v39 = vpop.eup %1898 }
 0x4d8   : > { %v1207_v40 = vmul.f32 %v1899_v39, %v1891_v18 }
 0x4da   : > { %v1208_v41 = vpack.c.bf16 %v1207_v40, %v1207_v40 }
 0x4dd   : > { %1702 = vmatmul.mubr.msk.bf16.vlgmr.msra.gmra.mrb[20].mxu0 %vm805_vm2, %v1208_v41 }
 0x52d   : > { %v905_v42 = vpop.f32.mrb[8].mxu0 }
 0x52e   : > { %911 = vst.msk [vmem:[#allocation2] sm:$0xff] %vm805_vm2, %v905_v42  ;;  %v1667_v43 = vpop.f32.mrb[9].mxu0 }
 0x52f   : > { %v908_v44 = vpop.f32.mrb[10].mxu0 }
 0x530   : > { %v1668_v45 = vpop.f32.mrb[11].mxu0 }
 0x59f   : > { %v1019_v46 = vpop.f32.mrb[12].mxu0 }
 0x5a0   : > { %1026 = vrot.lane.b32.xlu1 %v1019_v46, %s2336_s28  ;;  %v1679_v47 = vpop.f32.mrb[13].mxu0 }
 0x5a1   : > { %v1022_v48 = vpop.f32.mrb[14].mxu0 }
 0x5a2   : > { %v1680_v49 = vpop.f32.mrb[15].mxu0 }
 0x5a8   : > { %v1135_v52 = vpop.f32.mrb[16].mxu0 }
 0x5a9   : > { %1142 = vrot.lane.b32.xlu0 %v1135_v52, %s2337_s0  ;;  %v1691_v53 = vpop.f32.mrb[17].mxu0 }
 0x5aa   : > { %v1138_v54 = vpop.f32.mrb[18].mxu0 }
 0x5ab   : > { %v1692_v55 = vpop.f32.mrb[19].mxu0 }
 0x5b0   : > { %v1251_v56 = vpop.f32.mrb[20].mxu0 }
 0x5b1   : > { %1258 = vrot.lane.b32.xlu1 %v1251_v56, %s2338_s26  ;;  %v1703_v57 = vpop.f32.mrb[21].mxu0 }
 0x5b2   : > { %v1254_v58 = vpop.f32.mrb[22].mxu0 }
 0x5b3   : > { %v1704_v59 = vpop.f32.mrb[23].mxu0 }
 0x612   : > { %v1027_v60 = vpop.permute.xlu1 %1026 }
 0x613   : > { %1030 = vst.msk [vmem:[#allocation2] sm:$0xff] %vm1029_vm4, %v1027_v60 }
 0x61b   : > { %v1143_v0 = vpop.permute.xlu0 %1142 }
 0x61c   : > { %1146 = vst.msk [vmem:[#allocation2] sm:$0xff] %vm1145_vm5, %v1143_v0 }
 0x623   : > { %v1259_v61 = vpop.permute.xlu1 %1258 }
 0x624   : > { %1262 = vst.msk [vmem:[#allocation2] sm:$0xff] %vm1261_vm6, %v1259_v61 }
 0x62b   : > { %v1263_v62 = vld [vmem:[#allocation2] sm:$0xff] }
 0x62c   : > { %v1264_v63 = vpack.c.bf16 %v1263_v62, %v1263_v62 }
 0x62e   : > { %1710 = vmatmul.mubr.msk.bf16.vlgmr.msra.gmra.mrb[20].mxu1 %vm625_vm1, %v1264_v63 }
 0x701   : > { %v1325_v2 = vpop.f32.mrb[20].mxu1 }
 0x702   : > { %v1326_v3 = vadd.f32 %v1597_v1, %v1325_v2  ;;  %v1711_v4 = vpop.f32.mrb[21].mxu1 }
 0x703   : > { %v1328_v5 = vpop.f32.mrb[22].mxu1 }
 0x704   : > { %v1712_v6 = vpop.f32.mrb[23].mxu1  ;;  %1331 = vst.msk [vmem:[%s597_s27] sm:$0xff] %vm625_vm1, %v1326_v3 }
 0x705   : > { %2227 = shalt.err (!%p2224_p11)
}
 0x706   : > { %s2228_s7 = scalar_lea.hbm %s2898_s29, 128  ;;  %s2232_s0 = scalar_lea.hbm %s3031_s5, 256 }
 0x707   : > { %p2229_p13 = scmp.ne.s32.totalorder %s2898_s29, %s2228_s7  ;;  %p2233_p8 = scmp.lt.u32.totalorder %s2898_s29, %s3031_s5 }
 0x708   : > { %p2234_p12 = scmp.lt.u32.totalorder %s2232_s0, %s2228_s7  ;;  %p2236_p10 = scmp.lt.u32.totalorder %s2228_s7, %s2898_s29 }
 0x709   : > { %p2230_p2 = pnand %p2229_p13, %p3032_p3 }
 0x70a   : > { %p2235_p9 = por %p2234_p12, %p2233_p8 }
 0x70b   : > { %p2231_p4 = pneg %p2230_p2 }
 0x70c   : > { %p2237_p1 = por %p2236_p10, %p2235_p9 }
 0x70e   : > { %p2238_p5 = pnand %p2237_p1, %p2231_p4 }
 0x710   : > { %2241 = shalt.err (!%p2238_p5)
}
 0x711   : > { %1751 = dma.vmem_to_hbm [thread:$0]  (%p3032_p3), %s2900_s3, 128, %s2898_s29, %s1333_s25  }
 0x712 PF: > { %s3033_s12 = sld [smem:[#allocation31_spill]]  ;;  %s1359_s16 = sand.u32 1, %s2296_s17  }
 0x713   : > { %p3034_p0 = scmp.ne.s32.totalorder %s3006_s30, 0  ;;  %s1360_s27 = scalar_lea.sflag [#allocation5], %s1359_s16 }
 0x718   : > { %p3035_p6 = scmp.ge.s32.totalorder %s3033_s12, 2 }
 0x71a   : > { %p1789_p7 = pnand %p3035_p6, %p3034_p0 }
 0x71c   : > { %2291 = dma.done.wait (!%p1789_p7), %s1360_s27, 128  }
 0x71d   : > { %2293 = vsyncadd (!%p1789_p7), %s1360_s27, 4294967168  ;;  %s34_s22 = sadd.s32 1, %s3033_s12   ;;  %s3036_s20 = sld [smem:[#allocation34_spill]] }
 0x71e   : > { %p31_p11 = scmp.ge.s32.totalorder %s34_s22, 4   ;;  %s3037_s13 = sld [smem:[#allocation30_spill]] }
 0x71f   : > { %s3038_s21 = sld [smem:[#allocation33_spill]]  ;;  %s3039_s17 = smov %s2300_s18 }
 0x720   : > { %s3040_s18 = smov %s2304_s19  ;;  %33 = sbr.rel (!%p31_p11) target bundleno = 21 (0x15), region = 165 }
 0x723   : > { %s3041_s19 = smov %s3036_s20 }
 0x724   : > { %s3042_s20 = smov %s3037_s13 }
 0x727   :  { %1365 = vsyncpa [#allocation4], 1 }
 0x728   :  { %1367 = vsyncpa [#allocation4 + $0x1], 1 }
 0x729   :  { %1368 = vsyncpa [#allocation7], 1 }
 0x72a   :  { %1370 = vsyncpa [#allocation7 + $0x1], 1 }
 0x72b   :  { %1371 = vsyncpa [#allocation10], 1 }
 0x72c   :  { %1372 = vsyncpa [#allocation13], 1 }
 0x72d   :  { %1373 = vsyncpa [#allocation16], 1 }
 0x72e   :  { %1374 = vsyncpa [#allocation19], 1 }
 0x72f   :  { %1375 = vsyncpa [#allocation5], 1 }
 0x730   :  { %1377 = vsyncpa [#allocation5 + $0x1], 1 }

</bundles_post_ra>
